<compile_context>
chip_gen: v5e
topology: v5e:2x2
jax: 0.10.0
libtpu: 0.0.40
codegen_flags: <defaults>
</compile_context>

<pallas_src>
import functools

import jax
import jax.numpy as jnp
from jax import lax
from jax.experimental import pallas as pl
from jax.experimental.pallas import tpu as pltpu


def _conv_bn_silu_kernel(x_ref, w_ref, bias_ref, o_ref, *, H, K):
    """One batch group: 'same' conv (stride 1) + folded BN bias + SiLU.

    x_ref:    (NB, Hp, Wp*Cin)       bf16 padded input rows (NHWC, W,C flattened)
    w_ref:    (K, Wp*Cin, W*Cout)    bf16 banded block-Toeplitz weights
                                     (BN scale already folded in)
    bias_ref: (1, W*Cout)            f32 folded BN bias, tiled over W
    o_ref:    (NB*H, W*Cout)         f32 output rows (lane-dense)
    """
    NB = x_ref.shape[0]
    WpCin = x_ref.shape[2]
    WCout = o_ref.shape[1]

    acc = jnp.zeros((NB * H, WCout), jnp.float32)
    # K lane-dense MXU matmuls (static unroll over kh); bf16 in, f32 accumulate.
    for kh in range(K):
        lhs = x_ref[:, kh:kh + H, :].reshape(NB * H, WpCin)   # leading-dim collapse only
        acc = acc + jnp.dot(lhs, w_ref[kh], preferred_element_type=jnp.float32)

    y = acc + bias_ref[...]               # folded BatchNorm (eval) bias, f32
    o_ref[...] = (y * jax.nn.sigmoid(y)).astype(o_ref.dtype)   # SiLU, f32 VPU/EUP


@functools.partial(jax.jit, static_argnames=("k",))
def conv_bn_silu(x_nchw, weight, bn_gamma, bn_beta, bn_mean, bn_var, *, k=3):
    """x_nchw: (N, Cin, H, W); weight: (Cout, Cin, K, K) (PyTorch layouts)."""
    assert k % 2 == 1, "only odd kernels (autopad 'same', stride 1) supported"
    eps = 1e-5
    N, Cin, H, W = x_nchw.shape
    Cout = weight.shape[0]
    p = k // 2                       # autopad(k, None, 1), stride = 1 -> 'same'
    Hp, Wp = H + 2 * p, W + 2 * p

    # ---- glue (plain JAX, amortized): layout, pad, BN fold, banded weights ----
    x_nhwc = jnp.transpose(x_nchw, (0, 2, 3, 1)).astype(jnp.float32)
    x_pad = jnp.pad(x_nhwc, ((0, 0), (p, p), (p, p), (0, 0)))
    x_rows = x_pad.reshape(N, Hp, Wp * Cin).astype(jnp.bfloat16)   # bf16 MXU input

    scale = bn_gamma / jnp.sqrt(bn_var + eps)                      # (Cout,)
    bias = bn_beta - bn_mean * scale                               # (Cout,)
    w_hwio = jnp.transpose(weight, (2, 3, 1, 0)).astype(jnp.float32)   # (K,K,Cin,Cout)
    w_scaled = w_hwio * scale                                      # fold BN scale

    # Banded block-Toeplitz weights:
    #   B[kh, wp*Cin+ci, w*Cout+co] = w_scaled[kh, wp-w, ci, co] if 0 <= wp-w < K else 0
    sel = (jnp.arange(Wp)[None, :, None]
           == jnp.arange(W)[None, None, :] + jnp.arange(k)[:, None, None]
           ).astype(jnp.float32)                                   # (K(kw), Wp, W)
    B = jnp.einsum("kpw,hkio->hpiwo", sel, w_scaled)               # (K, Wp, Cin, W, Cout)
    B = B.reshape(k, Wp * Cin, W * Cout).astype(jnp.bfloat16)

    bias_row = jnp.tile(bias, W).reshape(1, W * Cout).astype(jnp.float32)

    nb = N   # whole batch per grid step at these sizes (grid over groups if larger)
    kernel = functools.partial(_conv_bn_silu_kernel, H=H, K=k)

    out_rows = pl.pallas_call(
        kernel,
        out_shape=jax.ShapeDtypeStruct((N * H, W * Cout), jnp.float32),
        grid_spec=pltpu.PrefetchScalarGridSpec(
            num_scalar_prefetch=0,
            grid=(N // nb,),
            in_specs=[
                pl.BlockSpec((nb, Hp, Wp * Cin), lambda g: (g, 0, 0)),
                pl.BlockSpec((k, Wp * Cin, W * Cout), lambda g: (0, 0, 0)),
                pl.BlockSpec((1, W * Cout), lambda g: (0, 0)),
            ],
            out_specs=pl.BlockSpec((nb * H, W * Cout), lambda g: (g, 0)),
        ),
        compiler_params=pltpu.CompilerParams(
            dimension_semantics=("parallel",)),
    )(x_rows, B, bias_row)

    out_nhwc = out_rows.reshape(N, H, W, Cout)
    return jnp.transpose(out_nhwc, (0, 3, 1, 2))   # back to NCHW


def reference_conv_bn_silu(x_nchw, weight, bn_gamma, bn_beta, bn_mean, bn_var, *, k=3):
    """Pure-JAX f32 reference: Conv2d(pad='same', no bias) -> BN(eval) -> SiLU."""
    eps = 1e-5
    p = k // 2
    y = lax.conv_general_dilated(
        x_nchw.astype(jnp.float32), weight.astype(jnp.float32),
        window_strides=(1, 1), padding=((p, p), (p, p)),
        dimension_numbers=("NCHW", "OIHW", "NCHW"))
    scale = (bn_gamma / jnp.sqrt(bn_var + eps)).reshape(1, -1, 1, 1)
    bias = (bn_beta - bn_mean * (bn_gamma / jnp.sqrt(bn_var + eps))).reshape(1, -1, 1, 1)
    y = y * scale + bias
    return y * jax.nn.sigmoid(y)


if __name__ == "__main__":
    # Conv(c1=4, c2=8, k=3, s=1) with default autopad -> p=1, groups=1, dilation=1.
    N, C1, H, W = 2, 4, 16, 16
    C2, K = 8, 3

    key = jax.random.PRNGKey(0)
    kx, kw, kg, kb, km, kv = jax.random.split(key, 6)

    x = jax.random.normal(kx, (N, C1, H, W), dtype=jnp.float32)
    weight = 0.1 * jax.random.normal(kw, (C2, C1, K, K), dtype=jnp.float32)
    bn_gamma = 1.0 + 0.1 * jax.random.normal(kg, (C2,), dtype=jnp.float32)
    bn_beta = 0.1 * jax.random.normal(kb, (C2,), dtype=jnp.float32)
    bn_mean = 0.1 * jax.random.normal(km, (C2,), dtype=jnp.float32)
    bn_var = jnp.abs(1.0 + 0.1 * jax.random.normal(kv, (C2,), dtype=jnp.float32))

    out = conv_bn_silu(x, weight, bn_gamma, bn_beta, bn_mean, bn_var, k=K)
    out = jax.block_until_ready(out)

    ref = reference_conv_bn_silu(x, weight, bn_gamma, bn_beta, bn_mean, bn_var, k=K)
    assert out.shape == (N, C2, H, W), out.shape
    # bf16 MXU inputs -> loosened tolerance vs the f32 reference.
    err = float(jnp.max(jnp.abs(out - ref)))
    assert jnp.allclose(out, ref, atol=3e-2, rtol=3e-2), err

    print("KERNEL_OK")
</pallas_src>

<mosaic_0001>
module attributes {stable_mosaic.version = 11 : i64} {
  func.func @_conv_bn_silu_kernel(%arg0: i32, %arg1: memref<2x18x72xbf16, #tpu.memory_space<vmem>>, %arg2: memref<3x72x128xbf16, #tpu.memory_space<vmem>>, %arg3: memref<1x128xf32, #tpu.memory_space<vmem>>, %arg4: memref<32x128xf32, #tpu.memory_space<vmem>>) attributes {dimension_semantics = [#tpu.dimension_semantics<parallel>], iteration_bounds = array<i64: 1>, scalar_prefetch = 0 : i64, scratch_operands = 0 : i64, tpu.core_type = #tpu.core_type<tc>, window_params = [{transform_indices = @transform_0, window_bounds = array<i64: 2, 18, 72>}, {pipeline_mode = #tpu.pipeline_mode<synchronous>, transform_indices = @transform_1, window_bounds = array<i64: 3, 72, 128>}, {pipeline_mode = #tpu.pipeline_mode<synchronous>, transform_indices = @transform_2, window_bounds = array<i64: 1, 128>}, {transform_indices = @transform_3, window_bounds = array<i64: 32, 128>}]} {
    %cst = arith.constant 0.000000e+00 : f32
    %0 = vector.broadcast %cst : f32 to vector<32x128xf32>
    %c0 = arith.constant 0 : index
    %c0_0 = arith.constant 0 : index
    %c0_1 = arith.constant 0 : index
    %1 = vector.load %arg1[%c0, %c0_0, %c0_1] : memref<2x18x72xbf16, #tpu.memory_space<vmem>>, vector<2x16x72xbf16>
    %2 = vector.shape_cast %1 : vector<2x16x72xbf16> to vector<32x72xbf16>
    %c0_2 = arith.constant 0 : index
    %c0_3 = arith.constant 0 : index
    %c0_4 = arith.constant 0 : index
    %3 = vector.load %arg2[%c0_2, %c0_3, %c0_4] : memref<3x72x128xbf16, #tpu.memory_space<vmem>>, vector<1x72x128xbf16>
    %4 = vector.shape_cast %3 : vector<1x72x128xbf16> to vector<72x128xbf16>
    %cst_5 = arith.constant dense<0.000000e+00> : vector<32x128xf32>
    %5 = tpu.matmul %2, %4, %cst_5 {dimension_numbers = #tpu.dot_dimension_numbers<[1], [0], [0], [1], [0, 0, 1, 1], [], []>} : vector<32x72xbf16>, vector<72x128xbf16>, vector<32x128xf32> -> vector<32x128xf32>
    %6 = arith.addf %0, %5 : vector<32x128xf32>
    %c0_6 = arith.constant 0 : index
    %c1 = arith.constant 1 : index
    %c0_7 = arith.constant 0 : index
    %7 = vector.load %arg1[%c0_6, %c1, %c0_7] : memref<2x18x72xbf16, #tpu.memory_space<vmem>>, vector<2x16x72xbf16>
    %8 = vector.shape_cast %7 : vector<2x16x72xbf16> to vector<32x72xbf16>
    %c1_8 = arith.constant 1 : index
    %c0_9 = arith.constant 0 : index
    %c0_10 = arith.constant 0 : index
    %9 = vector.load %arg2[%c1_8, %c0_9, %c0_10] : memref<3x72x128xbf16, #tpu.memory_space<vmem>>, vector<1x72x128xbf16>
    %10 = vector.shape_cast %9 : vector<1x72x128xbf16> to vector<72x128xbf16>
    %cst_11 = arith.constant dense<0.000000e+00> : vector<32x128xf32>
    %11 = tpu.matmul %8, %10, %cst_11 {dimension_numbers = #tpu.dot_dimension_numbers<[1], [0], [0], [1], [0, 0, 1, 1], [], []>} : vector<32x72xbf16>, vector<72x128xbf16>, vector<32x128xf32> -> vector<32x128xf32>
    %12 = arith.addf %6, %11 : vector<32x128xf32>
    %c0_12 = arith.constant 0 : index
    %c2 = arith.constant 2 : index
    %c0_13 = arith.constant 0 : index
    %13 = vector.load %arg1[%c0_12, %c2, %c0_13] : memref<2x18x72xbf16, #tpu.memory_space<vmem>>, vector<2x16x72xbf16>
    %14 = vector.shape_cast %13 : vector<2x16x72xbf16> to vector<32x72xbf16>
    %c2_14 = arith.constant 2 : index
    %c0_15 = arith.constant 0 : index
    %c0_16 = arith.constant 0 : index
    %15 = vector.load %arg2[%c2_14, %c0_15, %c0_16] : memref<3x72x128xbf16, #tpu.memory_space<vmem>>, vector<1x72x128xbf16>
    %16 = vector.shape_cast %15 : vector<1x72x128xbf16> to vector<72x128xbf16>
    %cst_17 = arith.constant dense<0.000000e+00> : vector<32x128xf32>
    %17 = tpu.matmul %14, %16, %cst_17 {dimension_numbers = #tpu.dot_dimension_numbers<[1], [0], [0], [1], [0, 0, 1, 1], [], []>} : vector<32x72xbf16>, vector<72x128xbf16>, vector<32x128xf32> -> vector<32x128xf32>
    %18 = arith.addf %12, %17 : vector<32x128xf32>
    %c0_18 = arith.constant 0 : index
    %c0_19 = arith.constant 0 : index
    %19 = vector.load %arg3[%c0_18, %c0_19] : memref<1x128xf32, #tpu.memory_space<vmem>>, vector<1x128xf32>
    %20 = vector.broadcast %19 : vector<1x128xf32> to vector<32x128xf32>
    %21 = arith.addf %18, %20 : vector<32x128xf32>
    %22 = arith.negf %21 : vector<32x128xf32>
    %23 = math.exp %22 : vector<32x128xf32>
    %cst_20 = arith.constant 1.000000e+00 : f32
    %24 = vector.broadcast %cst_20 : f32 to vector<32x128xf32>
    %25 = arith.addf %24, %23 : vector<32x128xf32>
    %26 = arith.divf %24, %25 : vector<32x128xf32>
    %27 = arith.mulf %21, %26 : vector<32x128xf32>
    %c0_21 = arith.constant 0 : index
    %c0_22 = arith.constant 0 : index
    %28 = vector.load %arg4[%c0_21, %c0_22] : memref<32x128xf32, #tpu.memory_space<vmem>>, vector<32x128xf32>
    tpu.vector_store %arg4[%c0_21, %c0_22], %27 {strides = array<i32>} : memref<32x128xf32, #tpu.memory_space<vmem>>, vector<32x128xf32>,
    return
  }
  func.func @transform_0(%arg0: i32) -> (i32, i32, i32) {
    %c0_i32 = arith.constant 0 : i32
    %c0_i32_0 = arith.constant 0 : i32
    %c0_i32_1 = arith.constant 0 : i32
    return %arg0, %c0_i32, %c0_i32_0 : i32, i32, i32
  }
  func.func @transform_1(%arg0: i32) -> (i32, i32, i32) {
    %c0_i32 = arith.constant 0 : i32
    %c0_i32_0 = arith.constant 0 : i32
    %c0_i32_1 = arith.constant 0 : i32
    %c0_i32_2 = arith.constant 0 : i32
    return %c0_i32, %c0_i32_0, %c0_i32_1 : i32, i32, i32
  }
  func.func @transform_2(%arg0: i32) -> (i32, i32) {
    %c0_i32 = arith.constant 0 : i32
    %c0_i32_0 = arith.constant 0 : i32
    %c0_i32_1 = arith.constant 0 : i32
    return %c0_i32, %c0_i32_0 : i32, i32
  }
  func.func @transform_3(%arg0: i32) -> (i32, i32) {
    %c0_i32 = arith.constant 0 : i32
    %c0_i32_0 = arith.constant 0 : i32
    return %arg0, %c0_i32 : i32, i32
  }
}

</mosaic_0001>

<bundles_post_ra>
// kernel: tile.8
= control target key start
LH: loop header
LB: loop body
LE: loop exit
PB: predicated region body
PF: predicated region fallthrough
CT: control target
= control target key end

     0   :  { %s28_s0 = inlined_call_operand.vmem [shape: f32[8], index: 0, kind: input, shape index: {}]   ;;  %s29_s1 = inlined_call_operand.vmem [shape: f32[16,8], index: 1, kind: output, shape index: {}]  }
   0x1   :  { %v4_v0 = vld [vmem:[%s28_s0] ss:$0 sm:$0xff] }
   0x2   :  { %5 = vst [vmem:[%s29_s1] sm:$0xff] %v4_v0 }
   0x3   :  { %8 = vst [vmem:[%s29_s1 + $0x8] sm:$0xff] %v4_v0 }

// kernel: tile.9
= control target key start
LH: loop header
LB: loop body
LE: loop exit
PB: predicated region body
PF: predicated region fallthrough
CT: control target
= control target key end

     0   :  { %s131_s10 = smov 120   ;;  %s132_s11 = smov 104   ;;  %vm3_vm0 = vcmask 64512   ;;  %vm9_vm1 = vcmask 1048512   ;;  %vm15_vm2 = vcmask 982912   ;;  %vm21_vm3 = vcmask 917312   ;;  %s207_s0 = inlined_call_operand.vmem [shape: f32[16,8], index: 0, kind: input, shape index: {}]   ;;  %s208_s1 = inlined_call_operand.vmem [shape: f32[1,128], index: 1, kind: output, shape index: {}]  }
   0x1   :  { %v101_v0 = vld [vmem:[%s207_s0 + $0xf] sm:$0x1]   ;;  %v103_v1 = vld [vmem:[%s207_s0 + $0xd] sm:$0x1]   ;;  %v105_v2 = vld [vmem:[%s207_s0 + $0xb] sm:$0x1]  }
   0x2   :  { %7 = vrot.lane.b32.xlu0 %v101_v0, %s131_s10  ;;  %19 = vrot.lane.b32.xlu1 %v103_v1, %s132_s11  ;;  %s133_s14 = smov 88   ;;  %v102_v3 = vld [vmem:[%s207_s0 + $0xe] sm:$0x1]   ;;  %v104_v4 = vld [vmem:[%s207_s0 + $0xc] sm:$0x1]   ;;  %s134_s19 = smov 112  }
   0x3   :  { %31 = vrot.lane.b32.xlu2 %v105_v2, %s133_s14  ;;  %s135_s20 = smov 96   ;;  %v106_v5 = vld [vmem:[%s207_s0 + $0xa] sm:$0x1]   ;;  %s136_s23 = smov 80   ;;  %v107_v6 = vld [vmem:[%s207_s0 + $0x9] sm:$0x1]  }
   0x4   :  { %v108_v7 = vld [vmem:[%s207_s0 + $0x8] sm:$0x1]   ;;  %s137_s28 = smov 72   ;;  %s138_s29 = smov 64   ;;  %v109_v8 = vld [vmem:[%s207_s0 + $0x7] sm:$0x1]  }
   0x5   :  { %s139_s3 = smov 56   ;;  %v110_v9 = vld [vmem:[%s207_s0 + $0x6] sm:$0x1]   ;;  %v111_v10 = vld [vmem:[%s207_s0 + $0x5] sm:$0x1]   ;;  %s140_s8 = smov 48  }
   0x6   :  { %s141_s9 = smov 40   ;;  %v112_v11 = vld [vmem:[%s207_s0 + $0x4] sm:$0x1]   ;;  %s142_s12 = smov 32   ;;  %v113_v12 = vld [vmem:[%s207_s0 + $0x3] sm:$0x1]  }
   0x7   :  { %v114_v13 = vld [vmem:[%s207_s0 + $0x2] sm:$0x1]   ;;  %s143_s17 = smov 24   ;;  %s144_s18 = smov 16   ;;  %v115_v14 = vld [vmem:[%s207_s0 + $0x1] sm:$0x1]  }
   0x8   :  { %s145_s21 = smov 8   ;;  %v2_v15 = vld [vmem:[%s207_s0] sm:$0x1]   ;;  %vm27_vm4 = vcmask 851712   ;;  %vm33_vm5 = vcmask 786112   ;;  %vm39_vm6 = vcmask 720512  }
   0x9   :  { %4 = vst.msk [vmem:[#allocation0] sm:$0x1] %vm3_vm0, %v2_v15   ;;  %vm45_vm7 = vcmask 654912   ;;  %vm51_vm8 = vcmask 589312   ;;  %vm57_vm9 = vcmask 523712   ;;  %vm63_vm10 = vcmask 458112  }
   0xa   :  { %13 = vrot.lane.b32.xlu0 %v102_v3, %s134_s19  ;;  %25 = vrot.lane.b32.xlu1 %v104_v4, %s135_s20  ;;  %vm69_vm11 = vcmask 392512   ;;  %vm75_vm12 = vcmask 326912   ;;  %vm81_vm13 = vcmask 261312   ;;  %vm87_vm14 = vcmask 195712  }
   0xb   :  { %37 = vrot.lane.b32.xlu2 %v106_v5, %s136_s23  ;;  %vm93_vm15 = vcmask 130112  }
  0x12   :  { %43 = vrot.lane.b32.xlu0 %v107_v6, %s137_s28  ;;  %49 = vrot.lane.b32.xlu1 %v108_v7, %s138_s29 }
  0x13   :  { %55 = vrot.lane.b32.xlu2 %v109_v8, %s139_s3 }
  0x1a   :  { %61 = vrot.lane.b32.xlu0 %v110_v9, %s140_s8  ;;  %67 = vrot.lane.b32.xlu1 %v111_v10, %s141_s9 }
  0x1b   :  { %73 = vrot.lane.b32.xlu2 %v112_v11, %s142_s12 }
  0x22   :  { %79 = vrot.lane.b32.xlu0 %v113_v12, %s143_s17  ;;  %85 = vrot.lane.b32.xlu1 %v114_v13, %s144_s18 }
  0x23   :  { %91 = vrot.lane.b32.xlu2 %v115_v14, %s145_s21 }
  0x5d   :  { %v32_v16 = vpop.permute.xlu2 %31  }
  0x65   :  { %v38_v17 = vpop.permute.xlu2 %37  }
  0x6d   :  { %v56_v18 = vpop.permute.xlu2 %55  }
  0x74   :  { %v8_v19 = vpop.permute.xlu0 %7   ;;  %v20_v20 = vpop.permute.xlu1 %19  }
  0x75   :  { %10 = vst.msk [vmem:[#allocation0] sm:$0x1] %vm9_vm1, %v8_v19   ;;  %v74_v21 = vpop.permute.xlu2 %73  }
  0x7c   :  { %v14_v22 = vpop.permute.xlu0 %13   ;;  %v26_v23 = vpop.permute.xlu1 %25  }
  0x7d   :  { %16 = vst.msk [vmem:[#allocation0] sm:$0x1] %vm15_vm2, %v14_v22   ;;  %v92_v24 = vpop.permute.xlu2 %91  }
  0x7e   :  { %22 = vst.msk [vmem:[#allocation0] sm:$0x1] %vm21_vm3, %v20_v20  }
  0x7f   :  { %28 = vst.msk [vmem:[#allocation0] sm:$0x1] %vm27_vm4, %v26_v23  }
  0x80   :  { %34 = vst.msk [vmem:[#allocation0] sm:$0x1] %vm33_vm5, %v32_v16  }
  0x81   :  { %40 = vst.msk [vmem:[#allocation0] sm:$0x1] %vm39_vm6, %v38_v17  }
  0x84   :  { %v44_v25 = vpop.permute.xlu0 %43   ;;  %v50_v26 = vpop.permute.xlu1 %49  }
  0x85   :  { %46 = vst.msk [vmem:[#allocation0] sm:$0x1] %vm45_vm7, %v44_v25  }
  0x86   :  { %52 = vst.msk [vmem:[#allocation0] sm:$0x1] %vm51_vm8, %v50_v26  }
  0x87   :  { %58 = vst.msk [vmem:[#allocation0] sm:$0x1] %vm57_vm9, %v56_v18  }
  0x8c   :  { %v62_v27 = vpop.permute.xlu0 %61   ;;  %v68_v28 = vpop.permute.xlu1 %67  }
  0x8d   :  { %64 = vst.msk [vmem:[#allocation0] sm:$0x1] %vm63_vm10, %v62_v27  }
  0x8e   :  { %70 = vst.msk [vmem:[#allocation0] sm:$0x1] %vm69_vm11, %v68_v28  }
  0x8f   :  { %76 = vst.msk [vmem:[#allocation0] sm:$0x1] %vm75_vm12, %v74_v21  }
  0x94   :  { %v80_v29 = vpop.permute.xlu0 %79   ;;  %v86_v30 = vpop.permute.xlu1 %85  }
  0x95   :  { %82 = vst.msk [vmem:[#allocation0] sm:$0x1] %vm81_vm13, %v80_v29  }
  0x96   :  { %88 = vst.msk [vmem:[#allocation0] sm:$0x1] %vm87_vm14, %v86_v30  }
  0x97   :  { %94 = vst.msk [vmem:[#allocation0] sm:$0x1] %vm93_vm15, %v92_v24  }
  0x9e   :  { %v97_v31 = vld [vmem:[#allocation0] sm:$0x1] }
  0x9f   :  { %100 = vst [vmem:[%s208_s1] sm:$0x1] %v97_v31 }

// kernel: conv_bn_silu.1
= control target key start
LH: loop header
LB: loop body
LE: loop exit
PB: predicated region body
PF: predicated region fallthrough
CT: control target
= control target key end

     0   :  { %vm131_vm0 = vcmask 1043456   ;;  %vm30_vm1 = vsmask.f32 3328  ;;  %vm31_vm2 = vsmask.f32 7440  ;;  %vm225_vm3 = vcmask 1042432   ;;  %s700_s1 = inlined_call_operand.vmem [shape: bf16[3,72,128], index: 1, kind: input, shape index: {}]   ;;  %s701_s0 = inlined_call_operand.vmem [shape: bf16[2,18,72], index: 0, kind: input, shape index: {}]   ;;  %s702_s2 = inlined_call_operand.vmem [shape: f32[1,128], index: 2, kind: input, shape index: {}]   ;;  %s703_s3 = inlined_call_operand.vmem [shape: f32[32,128], index: 3, kind: output, shape index: {}]  }
   0x1   :  { %v421_v0 = vld [vmem:[%s700_s1 + $0x44] sm:$0xf]  ;;  %v27_v1 = vld [vmem:[%s700_s1 + $0x20] sm:$0xf]  ;;  %v476_v2 = vld [vmem:[%s700_s1 + $0x68] sm:$0xf] }
   0x2   :  { %v114_v3 = vunpack.c.l.b16 %v421_v0  ;;  %v181_v4 = vunpack.c.l.b16 %v27_v1  ;;  %v275_v5 = vunpack.c.l.b16 %v476_v2  ;;  %v508_v9 = vld [vmem:[%s700_s1 + $0x3c] sm:$0xff]  ;;  %v16_v16 = vld [vmem:[%s701_s0 + $0x4] sm:$0xf]  ;;  %v28_v17 = vld [vmem:[%s701_s0 + $0x8] sm:$0x1]  ;;  %vm226_vm4 = vcmask 1046532  }
   0x3   :  { %v504_v10 = vld [vmem:[%s700_s1 + $0x18] sm:$0xff]  ;;  %v512_v14 = vld [vmem:[%s700_s1 + $0x60] sm:$0xff]  ;;  %v43_v20 = vshll.u32 %v16_v16, 16  ;;  %v47_v21 = vshrl.u32 %v16_v16, 16  ;;  %v53_v22 = vshll.u32 %v28_v17, 16  ;;  %v230_v24 = vrot.slane %v16_v16, 5  ;;  %vm609_vm5 = vmor %vm30_vm1, %vm31_vm2 }
   0x4   :  { %v119_v6 = vpack.c.b16 %v114_v3, %v114_v3  ;;  %v186_v7 = vpack.c.b16 %v181_v4, %v181_v4  ;;  %v280_v8 = vpack.c.b16 %v275_v5, %v275_v5  ;;  %v15_v15 = vld [vmem:[%s701_s0] sm:$0xf]  ;;  %v507_v25 = vld [vmem:[%s700_s1 + $0x34] sm:$0xff]  ;;  %v17_v28 = vld [vmem:[%s701_s0 + $0xc] sm:$0xf]  ;;  %v233_v35 = vrot.slane %v28_v17, 5 }
   0x5   :  { %v34_v18 = vshrl.u32 %v15_v15, 16  ;;  %v37_v19 = vshll.u32 %v15_v15, 16  ;;  %v219_v23 = vld [vmem:[%s701_s0] sm:$0xe]  ;;  %v45_v29 = vrot.slane %v43_v20, 5  ;;  %v49_v30 = vrot.slane %v47_v21, 4  ;;  %vm616_vm6 = vmor %vm225_vm3, %vm226_vm4 }
   0x6   :  { %v133_v11 = vsel %vm131_vm0, %v119_v6, 0  ;;  %v198_v12 = vsel %vm131_vm0, %v186_v7, 0  ;;  %v292_v13 = vsel %vm131_vm0, %v280_v8, 0  ;;  %v466_v31 = vrot.slane %v219_v23, 9  ;;  %v594_v32 = vld [vmem:[%s701_s0 + $0x10] sm:$0xf] }
   0x7   :  { %138 = vmatpush.bf16.msra.mxu0 %v133_v11  ;;  %203 = vmatpush.bf16.msra.mxu1 %v198_v12  ;;  %v36_v26 = vrot.slane %v34_v18, 4  ;;  %v39_v27 = vrot.slane %v37_v19, 5  ;;  %v503_v33 = vld [vmem:[%s700_s1 + $0x10] sm:$0xff]  ;;  %v58_v37 = vshrl.u32 %v17_v28, 16  ;;  %v61_v38 = vshll.u32 %v17_v28, 16  ;;  %v511_v39 = vld [vmem:[%s700_s1 + $0x58] sm:$0xff] }
   0x8   :  { %297 = vmatpush.bf16.msra.mxu2 %v292_v13  ;;  %513 = vmatpush.bf16.msra.mxu3 %v133_v11  ;;  %v602_v36 = vld [vmem:[%s701_s0 + $0x14] sm:$0x1]  ;;  %v50_v41 = vor.u32 %v49_v30, %v45_v29  ;;  %v55_v42 = vrot.slane %v53_v22, 5  ;;  %v232_v43 = vrot.slane %v230_v24, 4  ;;  %v67_v44 = vshll.u32 %v594_v32, 16  ;;  %v506_v53 = vld [vmem:[%s700_s1 + $0x2c] sm:$0xff] }
   0x9   :  { %v40_v34 = vor.u32 %v39_v27, %v36_v26  ;;  %v60_v47 = vrot.slane %v58_v37, 4  ;;  %v63_v48 = vrot.slane %v61_v38, 5  ;;  %v71_v51 = vshrl.u32 %v594_v32, 16  ;;  %v502_v54 = vld [vmem:[%s700_s1 + $0x8] sm:$0xff]  ;;  %v510_v57 = vld [vmem:[%s700_s1 + $0x50] sm:$0xff]  ;;  %v501_v4 = vld [vmem:[%s700_s1] sm:$0xff] }
   0xa   :  { %v51_v49 = vrot.slane %v50_v41, 4  ;;  %v69_v50 = vrot.slane %v67_v44, 5  ;;  %v77_v52 = vshll.u32 %v602_v36, 16  ;;  %v231_v59 = vsel %vm616_vm6, %v466_v31, %v230_v24  ;;  %v505_v3 = vld [vmem:[%s700_s1 + $0x24] sm:$0xff]  ;;  %v220_v18 = vld [vmem:[%s701_s0 + $0xc] sm:$0xe] }
   0xb   :  { %139 = vmatpush.bf16.msra.mxu0 %v508_v9  ;;  %204 = vmatpush.bf16.msra.mxu1 %v504_v10  ;;  %v41_v45 = vrot.slane %v40_v34, 4  ;;  %v64_v56 = vor.u32 %v63_v48, %v60_v47  ;;  %v234_v60 = vsel %vm616_vm6, %v232_v43, %v233_v35  ;;  %v73_v61 = vrot.slane %v71_v51, 4  ;;  %v509_v8 = vld [vmem:[%s700_s1 + $0x48] sm:$0xff]  ;;  %v499_v12 = vld [vmem:[%s701_s0] sm:$0xff] }
   0xc   :  { %298 = vmatpush.bf16.msra.mxu2 %v512_v14  ;;  %514 = vmatpush.bf16.msra.mxu3 %v508_v9  ;;  %v56_v58 = vsel %vm609_vm5, %v51_v49, %v55_v42  ;;  %v79_v2 = vrot.slane %v77_v52, 5  ;;  %v252_v5 = vunpack.c.l.b16 %v231_v59  ;;  %v253_v6 = vunpack.c.l.b16 %v234_v60  ;;  %v500_v26 = vld [vmem:[%s701_s0 + $0xc] sm:$0xff]  ;;  %v518_v31 = vld [vmem:[%s702_s2] ss:$0 sm:$0xff] }
   0xd   :  { %v46_v55 = vsel %vm609_vm5, %v41_v45, %v45_v29  ;;  %v65_v62 = vrot.slane %v64_v56, 4  ;;  %v92_v0 = vunpack.c.l.b16 %v56_v58  ;;  %v74_v1 = vor.u32 %v73_v61, %v69_v50 }
   0xe   :  { %v91_v63 = vunpack.c.l.b16 %v46_v55  ;;  %vm124_vm7 = vcmask 588800   ;;  %v256_v14 = vpack.c.b16 %v253_v6, %v252_v5  ;;  %v237_v16 = vrot.slane %v594_v32, 5 }
   0xf   :  { %140 = vmatpush.bf16.msra.mxu0 %v507_v25  ;;  %205 = vmatpush.bf16.msra.mxu1 %v503_v33  ;;  %v70_v7 = vsel %vm609_vm5, %v65_v62, %v69_v50  ;;  %v75_v9 = vrot.slane %v74_v1, 4  ;;  %v467_v19 = vrot.slane %v220_v18, 9  ;;  %v240_v21 = vrot.slane %v602_v36, 5 }
  0x10   :  { %299 = vmatpush.bf16.msra.mxu2 %v511_v39  ;;  %515 = vmatpush.bf16.msra.mxu3 %v507_v25  ;;  %v93_v10 = vunpack.c.l.b16 %v70_v7  ;;  %v95_v11 = vpack.c.b16 %v92_v0, %v91_v63  ;;  %v239_v20 = vrot.slane %v237_v16, 4 }
  0x11   :  { %v80_v13 = vsel %vm609_vm5, %v75_v9, %v79_v2  ;;  %v238_v22 = vsel %vm616_vm6, %v467_v19, %v237_v16 }
  0x12   :  { %v94_v15 = vunpack.c.l.b16 %v80_v13  ;;  %v241_v23 = vsel %vm616_vm6, %v239_v20, %v240_v21  ;;  %v254_v24 = vunpack.c.l.b16 %v238_v22 }
  0x13   :  { %141 = vmatpush.bf16.msra.mxu0 %v506_v53  ;;  %206 = vmatpush.bf16.msra.mxu1 %v502_v54  ;;  %v255_v25 = vunpack.c.l.b16 %v241_v23 }
  0x14   :  { %300 = vmatpush.bf16.msra.mxu2 %v510_v57  ;;  %516 = vmatpush.bf16.msra.mxu3 %v506_v53  ;;  %v96_v17 = vpack.c.b16 %v94_v15, %v93_v10 }
  0x15   :  { %v257_v27 = vpack.c.b16 %v255_v25, %v254_v24 }
  0x17   :  { %142 = vmatpush.bf16.msra.mxu0 %v505_v3  ;;  %207 = vmatpush.bf16.msra.mxu1 %v501_v4 }
  0x18   :  { %301 = vmatpush.bf16.msra.mxu2 %v509_v8  ;;  %517 = vmatpush.bf16.msra.mxu3 %v505_v3 }
  0x1a   :  { %438 = vmatmul.msk.bf16.vlgmr.msra.gmra.mxu0 %vm124_vm7, %v95_v11  ;;  %464 = vmatmul.msk.bf16.vlgmr.msra.gmra.mxu1 %vm124_vm7, %v499_v12 }
  0x1b   :  { %493 = vmatmul.msk.bf16.vlgmr.msra.gmra.mxu2 %vm124_vm7, %v256_v14  ;;  %439 = vmatmul.msk.bf16.vlgmr.msra.gmra.mxu3 %vm124_vm7, %v96_v17 }
  0x2a   :  { %465 = vmatmul.msk.bf16.gmra.mxu1 %vm124_vm7, %v500_v26 }
  0x2b   :  { %494 = vmatmul.msk.bf16.gmra.mxu2 %vm124_vm7, %v257_v27 }
  0x97   :  { %v209_v28 = vpop.f32.mrf.mxu1  ;;  %v144_v29 = vpop.f32.mrf.mxu0 }
  0x98   :  { %v210_v30 = vadd.f32 %v209_v28, %v144_v29 }
  0x9e   :  { %v303_v32 = vpop.f32.mrf.mxu2  ;;  %v149_v43 = vpop.f32.mrf.mxu3 }
  0x9f   :  { %v313_v33 = vadd.f32 %v303_v32, %v210_v30  ;;  %v211_v34 = vpop.f32.mrf.mxu1  ;;  %v146_v36 = vpop.f32.mrf.mxu0 }
  0xa0   :  { %v212_v38 = vadd.f32 %v211_v34, %v146_v36 }
  0xa1   :  { %v321_v35 = vadd.f32 %v518_v31, %v313_v33 }
  0xa3   :  { %v495_v37 = vmul.f32 -1.442695, %v321_v35 }
  0xa5   :  { %519 = vpow2.f32 %v495_v37 }
  0xa6   :  { %v305_v39 = vpop.f32.mrf.mxu2  ;;  %v151_v56 = vpop.f32.mrf.mxu3 }
  0xa7   :  { %v314_v40 = vadd.f32 %v305_v39, %v212_v38  ;;  %v214_v41 = vpop.f32.mrf.mxu1 }
  0xa8   :  { %v215_v46 = vadd.f32 %v214_v41, %v149_v43 }
  0xa9   :  { %v676_v42 = vadd.f32 %v518_v31, %v314_v40 }
  0xab   :  { %v520_v44 = vpop.eup %519  ;;  %v496_v45 = vmul.f32 -1.442695, %v676_v42 }
  0xac   :  { %v337_v47 = vadd.f32 1.0, %v520_v44 }
  0xad   :  { %521 = vpow2.f32 %v496_v45 }
  0xae   :  { %523 = vrcp.f32 %v337_v47  ;;  %v308_v48 = vpop.f32.mrf.mxu2  ;;  %v352_v62 = vand.u32 2147483648, %v337_v47  ;;  %v350_v0 = vand.u32 2147483647, %v337_v47  ;;  %vm346_vm9 = vweird.f32 %v337_v47 }
  0xaf   :  { %v315_v49 = vadd.f32 %v308_v48, %v215_v46  ;;  %v216_v51 = vpop.f32.mrf.mxu1 }
  0xb0   :  { %v217_v58 = vadd.f32 %v216_v51, %v151_v56  ;;  %v353_v6 = vor.u32 1.1754944e-38, %v352_v62  ;;  %vm351_vm11 = vcmp.eq.f32.partialorder %v350_v0, 8.507059e+37 }
  0xb1   :  { %v679_v50 = vadd.f32 %v518_v31, %v315_v49 }
  0xb3   :  { %v522_v52 = vpop.eup %521  ;;  %v497_v53 = vmul.f32 -1.442695, %v679_v50 }
  0xb4   :  { %v524_v54 = vpop.eup %523  ;;  %v338_v55 = vadd.f32 1.0, %v522_v52 }
  0xb5   :  { %v342_v57 = vmul.f32 %v524_v54, %v337_v47  ;;  %525 = vpow2.f32 %v497_v53  ;;  %vm347_vm8 = vweird.f32 %v524_v54 }
  0xb6   :  { %527 = vrcp.f32 %v338_v55  ;;  %v310_v59 = vpop.f32.mrf.mxu2  ;;  %vm348_vm10 = vmor %vm346_vm9, %vm347_vm8  ;;  %v367_v13 = vand.u32 2147483648, %v338_v55  ;;  %v365_v15 = vand.u32 2147483647, %v338_v55  ;;  %vm361_vm13 = vweird.f32 %v338_v55 }
  0xb7   :  { %v343_v60 = vsub.f32 1.0, %v342_v57  ;;  %v316_v61 = vadd.f32 %v310_v59, %v217_v58 }
  0xb8   :  { %v368_v19 = vor.u32 1.1754944e-38, %v367_v13  ;;  %vm366_vm15 = vcmp.eq.f32.partialorder %v365_v15, 8.507059e+37 }
  0xb9   :  { %v344_v63 = vmul.f32 %v524_v54, %v343_v60  ;;  %v682_v1 = vadd.f32 %v518_v31, %v316_v61 }
  0xbb   :  { %v526_v2 = vpop.eup %525  ;;  %v345_v3 = vadd.f32 %v524_v54, %v344_v63  ;;  %v498_v4 = vmul.f32 -1.442695, %v682_v1 }
  0xbc   :  { %v528_v5 = vpop.eup %527  ;;  %v339_v7 = vadd.f32 1.0, %v526_v2 }
  0xbd   :  { %v349_v8 = vsel %vm348_vm10, %v524_v54, %v345_v3  ;;  %v357_v9 = vmul.f32 %v528_v5, %v338_v55  ;;  %529 = vpow2.f32 %v498_v4  ;;  %vm362_vm12 = vweird.f32 %v528_v5 }
  0xbe   :  { %v354_v10 = vsel %vm351_vm11, %v353_v6, %v349_v8  ;;  %531 = vrcp.f32 %v339_v7  ;;  %vm363_vm14 = vmor %vm361_vm13, %vm362_vm12  ;;  %v382_v26 = vand.u32 2147483648, %v339_v7  ;;  %v380_v28 = vand.u32 2147483647, %v339_v7 }
  0xbf   :  { %v401_v11 = vmul.f32 %v354_v10, %v321_v35  ;;  %v358_v12 = vsub.f32 1.0, %v357_v9  ;;  %vm376_vm1 = vweird.f32 %v339_v7 }
  0xc0   :  { %v383_v31 = vor.u32 1.1754944e-38, %v382_v26  ;;  %vm381_vm3 = vcmp.eq.f32.partialorder %v380_v28, 8.507059e+37 }
  0xc1   :  { %405 = vst [vmem:[%s703_s3] sm:$0xff] %v401_v11  ;;  %v359_v14 = vmul.f32 %v528_v5, %v358_v12 }
  0xc3   :  { %v530_v16 = vpop.eup %529  ;;  %v360_v17 = vadd.f32 %v528_v5, %v359_v14 }
  0xc4   :  { %v532_v18 = vpop.eup %531  ;;  %v340_v20 = vadd.f32 1.0, %v530_v16 }
  0xc5   :  { %v364_v21 = vsel %vm363_vm14, %v528_v5, %v360_v17  ;;  %v372_v22 = vmul.f32 %v532_v18, %v339_v7  ;;  %vm377_vm0 = vweird.f32 %v532_v18 }
  0xc6   :  { %v369_v23 = vsel %vm366_vm15, %v368_v19, %v364_v21  ;;  %533 = vrcp.f32 %v340_v20  ;;  %vm378_vm2 = vmor %vm376_vm1, %vm377_vm0  ;;  %v397_v37 = vand.u32 2147483648, %v340_v20  ;;  %v395_v39 = vand.u32 2147483647, %v340_v20 }
  0xc7   :  { %v402_v24 = vmul.f32 %v369_v23, %v676_v42  ;;  %v373_v25 = vsub.f32 1.0, %v372_v22  ;;  %vm391_vm5 = vweird.f32 %v340_v20 }
  0xc8   :  { %v398_v41 = vor.u32 1.1754944e-38, %v397_v37  ;;  %vm396_vm7 = vcmp.eq.f32.partialorder %v395_v39, 8.507059e+37 }
  0xc9   :  { %406 = vst [vmem:[%s703_s3 + $0x8] sm:$0xff] %v402_v24  ;;  %v374_v27 = vmul.f32 %v532_v18, %v373_v25 }
  0xcb   :  { %v375_v29 = vadd.f32 %v532_v18, %v374_v27 }
  0xcc   :  { %v534_v30 = vpop.eup %533 }
  0xcd   :  { %v379_v32 = vsel %vm378_vm2, %v532_v18, %v375_v29  ;;  %v387_v33 = vmul.f32 %v534_v30, %v340_v20  ;;  %vm392_vm4 = vweird.f32 %v534_v30 }
  0xce   :  { %v384_v34 = vsel %vm381_vm3, %v383_v31, %v379_v32  ;;  %vm393_vm6 = vmor %vm391_vm5, %vm392_vm4 }
  0xcf   :  { %v403_v35 = vmul.f32 %v384_v34, %v679_v50  ;;  %v388_v36 = vsub.f32 1.0, %v387_v33 }
  0xd1   :  { %407 = vst [vmem:[%s703_s3 + $0x10] sm:$0xff] %v403_v35  ;;  %v389_v38 = vmul.f32 %v534_v30, %v388_v36 }
  0xd3   :  { %v390_v40 = vadd.f32 %v534_v30, %v389_v38 }
  0xd5   :  { %v394_v42 = vsel %vm393_vm6, %v534_v30, %v390_v40 }
  0xd6   :  { %v399_v43 = vsel %vm396_vm7, %v398_v41, %v394_v42 }
  0xd7   :  { %v404_v44 = vmul.f32 %v399_v43, %v682_v1 }
  0xd9   :  { %408 = vst [vmem:[%s703_s3 + $0x18] sm:$0xff] %v404_v44 }

</bundles_post_ra>
